<compile_context>
chip_gen: v5e
topology: v5e:2x2
jax: 0.10.0
libtpu: 0.0.40
codegen_flags: <defaults>
</compile_context>

<pallas_src>
import jax
import jax.numpy as jnp
from jax.experimental import pallas as pl
from jax.experimental.pallas import tpu as pltpu

LAYER_SIZES = [64, 128, 256, 128, 64, 1]  # fc1..fc6 output dims


def _round_up(n, m):
    return ((n + m - 1) // m) * m


def _mlp_kernel(x_ref,
                w1, b1, w2, b2, w3, b3, w4, b4, w5, b5, w6, b6,
                o_ref):
    h = x_ref[...]  # bf16 [tile, F]

    def dense_relu(h, w_ref, b_ref):
        # bf16 MXU operands, f32 accumulation.
        y = jnp.dot(h, w_ref[...], preferred_element_type=jnp.float32)
        # Bias + ReLU in f32 (v5e has no bf16 VPU path), then keep the
        # inter-layer intermediate in bf16 so spills / vld / vst are halved.
        return jnp.maximum(y + b_ref[...], 0.0).astype(jnp.bfloat16)

    h = dense_relu(h, w1, b1)
    h = dense_relu(h, w2, b2)
    h = dense_relu(h, w3, b3)
    h = dense_relu(h, w4, b4)
    h = dense_relu(h, w5, b5)            # bf16 [tile, 64]

    # Final 64 -> 1 layer, emitted lane-dense:
    #   [1, 64] . [tile, 64]^T -> [1, tile]   (f32 accumulation)
    # so the output block is a dense row instead of a lane-masked column.
    o = jnp.einsum("of,bf->ob", w6[...], h,
                   preferred_element_type=jnp.float32)
    o_ref[...] = o + b6[...]


def _vmem_capacity_bytes():
    try:
        return int(pltpu.get_tpu_info().vmem_capacity_bytes)
    except Exception:
        return 64 * 1024 * 1024  # conservative (v7x-sized) fallback


def _tile_limits():
    """(max rows per tile, vmem_limit_bytes) derived from physical VMEM."""
    if _vmem_capacity_bytes() >= 96 * 1024 * 1024:   # v5e / v6e: 128 MiB
        return 8192, 64 * 1024 * 1024
    return 4096, 32 * 1024 * 1024                     # v7x: 64 MiB per TC


def _pick_batch_tile(B, max_tile):
    if B < 512:
        # Tiny batches: one grid step; splitting would just add step overhead.
        return _round_up(B, 16)
    if B <= 2 * max_tile:
        # Two (or a few) tiles so the parallel axis feeds both v7x TensorCores.
        return min(max_tile, _round_up(pl.cdiv(B, 2), 128))
    # Very large batches: biggest tile that fits, with an even tile count so
    # neither TensorCore gets a straggler step.
    nt = pl.cdiv(B, max_tile)
    nt += nt % 2
    return _round_up(pl.cdiv(B, nt), 128)


def simple_nn_forward(x, params, *, batch_tile=None):
    """x: [B, input_size] float32; params: list of (W [in,out], b [1,out])."""
    B, F = x.shape
    max_tile, vmem_limit = _tile_limits()

    if batch_tile is None:
        batch_tile = _pick_batch_tile(B, max_tile)
    batch_tile = max(16, _round_up(int(batch_tile), 16))
    if batch_tile < B:
        # Multi-tile grids: keep the tile a multiple of 128 so both the bf16
        # input sublane tiling and the lane-dense output block stay aligned.
        batch_tile = _round_up(batch_tile, 128)

    num_tiles = pl.cdiv(B, batch_tile)
    B_pad = num_tiles * batch_tile

    # Pre-cast to bf16 once (it is the MXU LHS dtype anyway) and pad rows.
    # Padded rows compute ReLU(bias) garbage that is sliced off below.
    x_p = x.astype(jnp.bfloat16)
    if B_pad != B:
        x_p = jnp.pad(x_p, ((0, B_pad - B), (0, 0)))

    # Input activation tile.
    in_specs = [pl.BlockSpec((batch_tile, F), lambda i: (i, 0))]

    # Weights / biases (~170 KB in bf16) stay fully VMEM-resident for every
    # grid step via constant index maps.
    flat_params = []
    n_layers = len(params)
    for li, (w, b) in enumerate(params):
        if li < n_layers - 1:
            w_in = w.astype(jnp.bfloat16)                   # [in, out] MXU operand
        else:
            w_in = w.reshape(1, -1).astype(jnp.bfloat16)    # (1, 64) for lane-dense fc6
        b_in = b.astype(jnp.float32)
        in_specs.append(pl.BlockSpec(w_in.shape, lambda i: (0, 0)))
        in_specs.append(pl.BlockSpec(b_in.shape, lambda i: (0, 0)))
        flat_params.extend([w_in, b_in])

    out = pl.pallas_call(
        _mlp_kernel,
        out_shape=jax.ShapeDtypeStruct((1, B_pad), jnp.float32),
        grid=(num_tiles,),
        in_specs=in_specs,
        out_specs=pl.BlockSpec((1, batch_tile), lambda i: (0, i)),
        compiler_params=pltpu.CompilerParams(
            dimension_semantics=("parallel",),
            vmem_limit_bytes=vmem_limit,
        ),
    )(x_p, *flat_params)

    return out[0, :B].reshape(B, 1)


def init_params(input_size, key):
    """Deterministic init mirroring nn.Linear shapes (stored as [in, out])."""
    params = []
    in_dim = input_size
    for out_dim in LAYER_SIZES:
        key, kw, kb = jax.random.split(key, 3)
        bound = 1.0 / jnp.sqrt(jnp.float32(in_dim))
        w = jax.random.uniform(kw, (in_dim, out_dim), jnp.float32, -bound, bound)
        b = jax.random.uniform(kb, (1, out_dim), jnp.float32, -bound, bound)
        params.append((w, b))
        in_dim = out_dim
    return params


def reference_forward_f32(x, params):
    """Pure f32 reference (matches the PyTorch module math)."""
    h = x
    for i, (w, b) in enumerate(params):
        h = h @ w + b
        if i < len(params) - 1:
            h = jnp.maximum(h, 0.0)
    return h


def reference_forward_mixed(x, params):
    """Reference mirroring the kernel's precision choices exactly."""
    h = x.astype(jnp.bfloat16)
    for (w, b) in params[:-1]:
        y = jnp.dot(h, w.astype(jnp.bfloat16), preferred_element_type=jnp.float32)
        h = jnp.maximum(y + b, 0.0).astype(jnp.bfloat16)
    w6, b6 = params[-1]
    y = jnp.dot(h, w6.astype(jnp.bfloat16), preferred_element_type=jnp.float32)
    return y + b6


if __name__ == "__main__":
    key = jax.random.PRNGKey(0)
    key, kx = jax.random.split(key)

    input_size = 16   # corresponds to X_train.shape[1]
    batch = 8

    params = init_params(input_size, key)
    x = jax.random.normal(kx, (batch, input_size), dtype=jnp.float32)

    # Small batch: single grid step.
    out = simple_nn_forward(x, params)
    jax.block_until_ready(out)
    assert out.shape == (batch, 1)
    ref_mixed = reference_forward_mixed(x, params)
    assert jnp.allclose(out, ref_mixed, atol=2e-2, rtol=2e-2)
    ref_f32 = reference_forward_f32(x, params)
    assert jnp.allclose(out, ref_f32, atol=1e-1, rtol=1e-1)

    # Larger (non-multiple) batch: exercises padding + the multi-tile
    # "parallel" grid path used for v7x's two TensorCores.
    x2 = jax.random.normal(jax.random.PRNGKey(1), (1030, input_size),
                           dtype=jnp.float32)
    out2 = simple_nn_forward(x2, params)
    jax.block_until_ready(out2)
    assert out2.shape == (1030, 1)
    assert jnp.allclose(out2, reference_forward_mixed(x2, params),
                        atol=2e-2, rtol=2e-2)
    assert jnp.allclose(out2, reference_forward_f32(x2, params),
                        atol=1e-1, rtol=1e-1)

    print("KERNEL_OK")
</pallas_src>

<mosaic_0001>
module attributes {stable_mosaic.version = 11 : i64} {
  func.func @_mlp_kernel(%arg0: i32, %arg1: memref<16x16xbf16, #tpu.memory_space<vmem>>, %arg2: memref<16x64xbf16, #tpu.memory_space<vmem>>, %arg3: memref<1x64xf32, #tpu.memory_space<vmem>>, %arg4: memref<64x128xbf16, #tpu.memory_space<vmem>>, %arg5: memref<1x128xf32, #tpu.memory_space<vmem>>, %arg6: memref<128x256xbf16, #tpu.memory_space<vmem>>, %arg7: memref<1x256xf32, #tpu.memory_space<vmem>>, %arg8: memref<256x128xbf16, #tpu.memory_space<vmem>>, %arg9: memref<1x128xf32, #tpu.memory_space<vmem>>, %arg10: memref<128x64xbf16, #tpu.memory_space<vmem>>, %arg11: memref<1x64xf32, #tpu.memory_space<vmem>>, %arg12: memref<1x64xbf16, #tpu.memory_space<vmem>>, %arg13: memref<1x1xf32, #tpu.memory_space<vmem>>, %arg14: memref<1x16xf32, #tpu.memory_space<vmem>>) attributes {dimension_semantics = [#tpu.dimension_semantics<parallel>], iteration_bounds = array<i64: 1>, scalar_prefetch = 0 : i64, scratch_operands = 0 : i64, tpu.core_type = #tpu.core_type<tc>, window_params = [{transform_indices = @transform_0, window_bounds = array<i64: 16, 16>}, {pipeline_mode = #tpu.pipeline_mode<synchronous>, transform_indices = @transform_1, window_bounds = array<i64: 16, 64>}, {pipeline_mode = #tpu.pipeline_mode<synchronous>, transform_indices = @transform_2, window_bounds = array<i64: 1, 64>}, {pipeline_mode = #tpu.pipeline_mode<synchronous>, transform_indices = @transform_3, window_bounds = array<i64: 64, 128>}, {pipeline_mode = #tpu.pipeline_mode<synchronous>, transform_indices = @transform_4, window_bounds = array<i64: 1, 128>}, {pipeline_mode = #tpu.pipeline_mode<synchronous>, transform_indices = @transform_5, window_bounds = array<i64: 128, 256>}, {pipeline_mode = #tpu.pipeline_mode<synchronous>, transform_indices = @transform_6, window_bounds = array<i64: 1, 256>}, {pipeline_mode = #tpu.pipeline_mode<synchronous>, transform_indices = @transform_7, window_bounds = array<i64: 256, 128>}, {pipeline_mode = #tpu.pipeline_mode<synchronous>, transform_indices = @transform_8, window_bounds = array<i64: 1, 128>}, {pipeline_mode = #tpu.pipeline_mode<synchronous>, transform_indices = @transform_9, window_bounds = array<i64: 128, 64>}, {pipeline_mode = #tpu.pipeline_mode<synchronous>, transform_indices = @transform_10, window_bounds = array<i64: 1, 64>}, {pipeline_mode = #tpu.pipeline_mode<synchronous>, transform_indices = @transform_11, window_bounds = array<i64: 1, 64>}, {pipeline_mode = #tpu.pipeline_mode<synchronous>, transform_indices = @transform_12, window_bounds = array<i64: 1, 1>}, {transform_indices = @transform_13, window_bounds = array<i64: 1, 16>}]} {
    %c0 = arith.constant 0 : index
    %c0_0 = arith.constant 0 : index
    %0 = vector.load %arg1[%c0, %c0_0] : memref<16x16xbf16, #tpu.memory_space<vmem>>, vector<16x16xbf16>
    %c0_1 = arith.constant 0 : index
    %c0_2 = arith.constant 0 : index
    %1 = vector.load %arg2[%c0_1, %c0_2] : memref<16x64xbf16, #tpu.memory_space<vmem>>, vector<16x64xbf16>
    %cst = arith.constant dense<0.000000e+00> : vector<16x64xf32>
    %2 = tpu.matmul %0, %1, %cst {dimension_numbers = #tpu.dot_dimension_numbers<[1], [0], [0], [1], [0, 0, 1, 1], [], []>} : vector<16x16xbf16>, vector<16x64xbf16>, vector<16x64xf32> -> vector<16x64xf32>
    %c0_3 = arith.constant 0 : index
    %c0_4 = arith.constant 0 : index
    %3 = vector.load %arg3[%c0_3, %c0_4] : memref<1x64xf32, #tpu.memory_space<vmem>>, vector<1x64xf32>
    %4 = vector.broadcast %3 : vector<1x64xf32> to vector<16x64xf32>
    %5 = arith.addf %2, %4 : vector<16x64xf32>
    %cst_5 = arith.constant 0.000000e+00 : f32
    %6 = vector.broadcast %cst_5 : f32 to vector<16x64xf32>
    %7 = arith.maximumf %5, %6 : vector<16x64xf32>
    %8 = arith.truncf %7 : vector<16x64xf32> to vector<16x64xbf16>
    %c0_6 = arith.constant 0 : index
    %c0_7 = arith.constant 0 : index
    %9 = vector.load %arg4[%c0_6, %c0_7] : memref<64x128xbf16, #tpu.memory_space<vmem>>, vector<64x128xbf16>
    %cst_8 = arith.constant dense<0.000000e+00> : vector<16x128xf32>
    %10 = tpu.matmul %8, %9, %cst_8 {dimension_numbers = #tpu.dot_dimension_numbers<[1], [0], [0], [1], [0, 0, 1, 1], [], []>} : vector<16x64xbf16>, vector<64x128xbf16>, vector<16x128xf32> -> vector<16x128xf32>
    %c0_9 = arith.constant 0 : index
    %c0_10 = arith.constant 0 : index
    %11 = vector.load %arg5[%c0_9, %c0_10] : memref<1x128xf32, #tpu.memory_space<vmem>>, vector<1x128xf32>
    %12 = vector.broadcast %11 : vector<1x128xf32> to vector<16x128xf32>
    %13 = arith.addf %10, %12 : vector<16x128xf32>
    %cst_11 = arith.constant 0.000000e+00 : f32
    %14 = vector.broadcast %cst_11 : f32 to vector<16x128xf32>
    %15 = arith.maximumf %13, %14 : vector<16x128xf32>
    %16 = arith.truncf %15 : vector<16x128xf32> to vector<16x128xbf16>
    %c0_12 = arith.constant 0 : index
    %c0_13 = arith.constant 0 : index
    %17 = vector.load %arg6[%c0_12, %c0_13] : memref<128x256xbf16, #tpu.memory_space<vmem>>, vector<128x256xbf16>
    %cst_14 = arith.constant dense<0.000000e+00> : vector<16x256xf32>
    %18 = tpu.matmul %16, %17, %cst_14 {dimension_numbers = #tpu.dot_dimension_numbers<[1], [0], [0], [1], [0, 0, 1, 1], [], []>} : vector<16x128xbf16>, vector<128x256xbf16>, vector<16x256xf32> -> vector<16x256xf32>
    %c0_15 = arith.constant 0 : index
    %c0_16 = arith.constant 0 : index
    %19 = vector.load %arg7[%c0_15, %c0_16] : memref<1x256xf32, #tpu.memory_space<vmem>>, vector<1x256xf32>
    %20 = vector.broadcast %19 : vector<1x256xf32> to vector<16x256xf32>
    %21 = arith.addf %18, %20 : vector<16x256xf32>
    %cst_17 = arith.constant 0.000000e+00 : f32
    %22 = vector.broadcast %cst_17 : f32 to vector<16x256xf32>
    %23 = arith.maximumf %21, %22 : vector<16x256xf32>
    %24 = arith.truncf %23 : vector<16x256xf32> to vector<16x256xbf16>
    %c0_18 = arith.constant 0 : index
    %c0_19 = arith.constant 0 : index
    %25 = vector.load %arg8[%c0_18, %c0_19] : memref<256x128xbf16, #tpu.memory_space<vmem>>, vector<256x128xbf16>
    %cst_20 = arith.constant dense<0.000000e+00> : vector<16x128xf32>
    %26 = tpu.matmul %24, %25, %cst_20 {dimension_numbers = #tpu.dot_dimension_numbers<[1], [0], [0], [1], [0, 0, 1, 1], [], []>} : vector<16x256xbf16>, vector<256x128xbf16>, vector<16x128xf32> -> vector<16x128xf32>
    %c0_21 = arith.constant 0 : index
    %c0_22 = arith.constant 0 : index
    %27 = vector.load %arg9[%c0_21, %c0_22] : memref<1x128xf32, #tpu.memory_space<vmem>>, vector<1x128xf32>
    %28 = vector.broadcast %27 : vector<1x128xf32> to vector<16x128xf32>
    %29 = arith.addf %26, %28 : vector<16x128xf32>
    %cst_23 = arith.constant 0.000000e+00 : f32
    %30 = vector.broadcast %cst_23 : f32 to vector<16x128xf32>
    %31 = arith.maximumf %29, %30 : vector<16x128xf32>
    %32 = arith.truncf %31 : vector<16x128xf32> to vector<16x128xbf16>
    %c0_24 = arith.constant 0 : index
    %c0_25 = arith.constant 0 : index
    %33 = vector.load %arg10[%c0_24, %c0_25] : memref<128x64xbf16, #tpu.memory_space<vmem>>, vector<128x64xbf16>
    %cst_26 = arith.constant dense<0.000000e+00> : vector<16x64xf32>
    %34 = tpu.matmul %32, %33, %cst_26 {dimension_numbers = #tpu.dot_dimension_numbers<[1], [0], [0], [1], [0, 0, 1, 1], [], []>} : vector<16x128xbf16>, vector<128x64xbf16>, vector<16x64xf32> -> vector<16x64xf32>
    %c0_27 = arith.constant 0 : index
    %c0_28 = arith.constant 0 : index
    %35 = vector.load %arg11[%c0_27, %c0_28] : memref<1x64xf32, #tpu.memory_space<vmem>>, vector<1x64xf32>
    %36 = vector.broadcast %35 : vector<1x64xf32> to vector<16x64xf32>
    %37 = arith.addf %34, %36 : vector<16x64xf32>
    %cst_29 = arith.constant 0.000000e+00 : f32
    %38 = vector.broadcast %cst_29 : f32 to vector<16x64xf32>
    %39 = arith.maximumf %37, %38 : vector<16x64xf32>
    %40 = arith.truncf %39 : vector<16x64xf32> to vector<16x64xbf16>
    %c0_30 = arith.constant 0 : index
    %c0_31 = arith.constant 0 : index
    %41 = vector.load %arg12[%c0_30, %c0_31] : memref<1x64xbf16, #tpu.memory_space<vmem>>, vector<1x64xbf16>
    "tpu.trace_start"() <{level = 10 : i32, message = "of,bf->ob"}> : () -> ()
    %cst_32 = arith.constant dense<0.000000e+00> : vector<1x16xf32>
    %42 = tpu.matmul %41, %40, %cst_32 {dimension_numbers = #tpu.dot_dimension_numbers<[1], [1], [0], [0], [0, 0, 1, 0], [], []>} : vector<1x64xbf16>, vector<16x64xbf16>, vector<1x16xf32> -> vector<1x16xf32>
    "tpu.trace_stop"() : () -> ()
    %c0_33 = arith.constant 0 : index
    %c0_34 = arith.constant 0 : index
    %43 = vector.load %arg13[%c0_33, %c0_34] : memref<1x1xf32, #tpu.memory_space<vmem>>, vector<1x1xf32>
    %44 = vector.broadcast %43 : vector<1x1xf32> to vector<1x16xf32>
    %45 = arith.addf %42, %44 : vector<1x16xf32>
    %c0_35 = arith.constant 0 : index
    %c0_36 = arith.constant 0 : index
    %46 = vector.load %arg14[%c0_35, %c0_36] : memref<1x16xf32, #tpu.memory_space<vmem>>, vector<1x16xf32>
    tpu.vector_store %arg14[%c0_35, %c0_36], %45 {strides = array<i32>} : memref<1x16xf32, #tpu.memory_space<vmem>>, vector<1x16xf32>,
    return
  }
  func.func @transform_0(%arg0: i32) -> (i32, i32) {
    %c0_i32 = arith.constant 0 : i32
    %c0_i32_0 = arith.constant 0 : i32
    return %arg0, %c0_i32 : i32, i32
  }
  func.func @transform_1(%arg0: i32) -> (i32, i32) {
    %c0_i32 = arith.constant 0 : i32
    %c0_i32_0 = arith.constant 0 : i32
    %c0_i32_1 = arith.constant 0 : i32
    return %c0_i32, %c0_i32_0 : i32, i32
  }
  func.func @transform_2(%arg0: i32) -> (i32, i32) {
    %c0_i32 = arith.constant 0 : i32
    %c0_i32_0 = arith.constant 0 : i32
    %c0_i32_1 = arith.constant 0 : i32
    return %c0_i32, %c0_i32_0 : i32, i32
  }
  func.func @transform_3(%arg0: i32) -> (i32, i32) {
    %c0_i32 = arith.constant 0 : i32
    %c0_i32_0 = arith.constant 0 : i32
    %c0_i32_1 = arith.constant 0 : i32
    return %c0_i32, %c0_i32_0 : i32, i32
  }
  func.func @transform_4(%arg0: i32) -> (i32, i32) {
    %c0_i32 = arith.constant 0 : i32
    %c0_i32_0 = arith.constant 0 : i32
    %c0_i32_1 = arith.constant 0 : i32
    return %c0_i32, %c0_i32_0 : i32, i32
  }
  func.func @transform_5(%arg0: i32) -> (i32, i32) {
    %c0_i32 = arith.constant 0 : i32
    %c0_i32_0 = arith.constant 0 : i32
    %c0_i32_1 = arith.constant 0 : i32
    return %c0_i32, %c0_i32_0 : i32, i32
  }
  func.func @transform_6(%arg0: i32) -> (i32, i32) {
    %c0_i32 = arith.constant 0 : i32
    %c0_i32_0 = arith.constant 0 : i32
    %c0_i32_1 = arith.constant 0 : i32
    return %c0_i32, %c0_i32_0 : i32, i32
  }
  func.func @transform_7(%arg0: i32) -> (i32, i32) {
    %c0_i32 = arith.constant 0 : i32
    %c0_i32_0 = arith.constant 0 : i32
    %c0_i32_1 = arith.constant 0 : i32
    return %c0_i32, %c0_i32_0 : i32, i32
  }
  func.func @transform_8(%arg0: i32) -> (i32, i32) {
    %c0_i32 = arith.constant 0 : i32
    %c0_i32_0 = arith.constant 0 : i32
    %c0_i32_1 = arith.constant 0 : i32
    return %c0_i32, %c0_i32_0 : i32, i32
  }
  func.func @transform_9(%arg0: i32) -> (i32, i32) {
    %c0_i32 = arith.constant 0 : i32
    %c0_i32_0 = arith.constant 0 : i32
    %c0_i32_1 = arith.constant 0 : i32
    return %c0_i32, %c0_i32_0 : i32, i32
  }
  func.func @transform_10(%arg0: i32) -> (i32, i32) {
    %c0_i32 = arith.constant 0 : i32
    %c0_i32_0 = arith.constant 0 : i32
    %c0_i32_1 = arith.constant 0 : i32
    return %c0_i32, %c0_i32_0 : i32, i32
  }
  func.func @transform_11(%arg0: i32) -> (i32, i32) {
    %c0_i32 = arith.constant 0 : i32
    %c0_i32_0 = arith.constant 0 : i32
    %c0_i32_1 = arith.constant 0 : i32
    return %c0_i32, %c0_i32_0 : i32, i32
  }
  func.func @transform_12(%arg0: i32) -> (i32, i32) {
    %c0_i32 = arith.constant 0 : i32
    %c0_i32_0 = arith.constant 0 : i32
    %c0_i32_1 = arith.constant 0 : i32
    return %c0_i32, %c0_i32_0 : i32, i32
  }
  func.func @transform_13(%arg0: i32) -> (i32, i32) {
    %c0_i32 = arith.constant 0 : i32
    %c0_i32_0 = arith.constant 0 : i32
    return %c0_i32, %arg0 : i32, i32
  }
}

</mosaic_0001>

<bundles_post_ra>
// kernel: tpu_custom_call.1
= control target key start
LH: loop header
LB: loop body
LE: loop exit
PB: predicated region body
PF: predicated region fallthrough
CT: control target
= control target key end

     0   :  { %s1085_s0 = inlined_call_operand.vmem [shape: bf16[16,16], index: 0, kind: input, shape index: {}]   ;;  %s1086_s1 = inlined_call_operand.vmem [shape: bf16[16,64], index: 1, kind: input, shape index: {}]   ;;  %s1087_s2 = inlined_call_operand.vmem [shape: f32[1,64], index: 2, kind: input, shape index: {}]   ;;  %s1088_s3 = inlined_call_operand.vmem [shape: bf16[64,128], index: 3, kind: input, shape index: {}]   ;;  %s1089_s4 = inlined_call_operand.vmem [shape: f32[1,128], index: 4, kind: input, shape index: {}]   ;;  %s1090_s5 = inlined_call_operand.hbm [shape: bf16[128,256], index: 5, kind: input, shape index: {}]   ;;  %s1091_s6 = inlined_call_operand.vmem [shape: f32[1,256], index: 6, kind: input, shape index: {}]   ;;  %s1092_s7 = inlined_call_operand.hbm [shape: bf16[256,128], index: 7, kind: input, shape index: {}]   ;;  %s1093_s8 = inlined_call_operand.vmem [shape: f32[1,128], index: 8, kind: input, shape index: {}]   ;;  %s1094_s9 = inlined_call_operand.vmem [shape: bf16[128,64], index: 9, kind: input, shape index: {}]   ;;  %s1095_s10 = inlined_call_operand.vmem [shape: f32[1,64], index: 10, kind: input, shape index: {}]   ;;  %s1096_s11 = inlined_call_operand.vmem [shape: bf16[1,64], index: 11, kind: input, shape index: {}]   ;;  %s1097_s12 = inlined_call_operand.<no memory space> [shape: f32[1,1], index: 12, kind: input, shape index: {}]   ;;  %s1098_s13 = inlined_call_operand.hbm [shape: f32[1,16], index: 13, kind: output, shape index: {}]  }
   0x1   :  { %v18_v0 = vstv %s1097_s12 }
   0x2   :  { %19 = vst [vmem:[#allocation2] sm:$0x1] %v18_v0 }
   0x3   :  { %20 = vsyncpa [#allocation4], 0 }
   0x4   :  { %21 = vsyncpa [#allocation7], 0 }
   0x5   :  { %22 = vsyncpa [#allocation5], 0  ;;  %s37_s29 = sshll.u32 %s1090_s5, 4  ;;  %s932_s30 = smov [#allocation3]   ;;  %s38_s29 = int_to_ptr.hbm [resolvable:$true] %s37_s29 }
   0x6   :  { %s39_s14 = sshll.u32 %s932_s30, 4  ;;  %s52_s17 = sshll.u32 %s1092_s7, 4  ;;  %s40_s14 = int_to_ptr.vmem [resolvable:$true] %s39_s14  ;;  %s53_s17 = int_to_ptr.hbm [resolvable:$true] %s52_s17 }
   0x7   :  { %s933_s18 = smov 128   ;;  %s934_s19 = smov 8  }
   0x8   :  { %45 = dma.hbm_to_vmem [thread:$0]  %s38_s29, 2048, %s40_s14, [#allocation4], %s933_s18, %s933_s18, %s934_s19  }
   0x9   :  { %s935_s12 = smov [#allocation6]   ;;  %s936_s21 = smov 64  }
   0xa   :  { %s54_s20 = sshll.u32 %s935_s12, 4  ;;  %s937_s22 = smov 4   ;;  %s55_s20 = int_to_ptr.vmem [resolvable:$true] %s54_s20 }
   0xb   :  { %60 = dma.hbm_to_vmem [thread:$0]  %s53_s17, 2048, %s55_s20, [#allocation7], %s936_s21, %s936_s21, %s937_s22  }
   0xc   :  { %926 = dma.done.wait [#allocation4], 2048  }
   0xd   :  { %927 = vsyncadd [#allocation4], 4294965248 }
   0xe   :  { %928 = dma.done.wait [#allocation7], 2048  }
   0xf   :  { %929 = vsyncadd [#allocation7], 4294965248  ;;  %v796_v1 = vld [vmem:[%s1086_s1] sm:$0xff]  ;;  %vm99_vm0 = vcmask 130048   ;;  %v800_v3 = vld [vmem:[%s1088_s3 + $0x18] sm:$0xff]  ;;  %vm156_vm1 = vcmask 523264  }
  0x10   :  { %v795_v2 = vld [vmem:[%s1085_s0] sm:$0xff]  ;;  %110 = vmatpush.bf16.msra.mxu0 %v796_v1  ;;  %164 = vmatpush.bf16.msra.mxu1 %v800_v3  ;;  %v799_v4 = vld [vmem:[%s1088_s3 + $0x10] sm:$0xff]  ;;  %v798_v5 = vld [vmem:[%s1088_s3 + $0x8] sm:$0xff]  ;;  %s597_s15 = sshll.u32 %s1098_s13, 4  ;;  %vm588_vm2 = vcmask 122880   ;;  %s598_s15 = int_to_ptr.hbm [resolvable:$true] %s597_s15 }
  0x11   :  { %v797_v6 = vld [vmem:[%s1088_s3] sm:$0xff]  ;;  %v692_v7 = vld [vmem:[#allocation3 + $0x70] sm:$0xf]  ;;  %v816_v8 = vld [vmem:[#allocation3 + $0x74] sm:$0xf0]  ;;  %s939_s3 = smov [#allocation8]  }
  0x12   :  { %v815_v9 = vld [vmem:[#allocation3 + $0x74] sm:$0xf]  ;;  %v693_v10 = vor.u32 %v816_v8, %v692_v7  ;;  %v694_v11 = vld [vmem:[#allocation3 + $0x78] sm:$0xf0]  ;;  %v684_v12 = vld [vmem:[#allocation3 + $0x60] sm:$0xf] }
  0x13   :  { %616 = vmatmul.msk.bf16.vlgmr.msra.gmra.mxu0 %vm99_vm0, %v795_v2  ;;  %v814_v13 = vld [vmem:[#allocation3 + $0x64] sm:$0xf0]  ;;  %v697_v14 = vor.u32 %v815_v9, %v694_v11  ;;  %v813_v15 = vld [vmem:[#allocation3 + $0x64] sm:$0xf]  ;;  %v686_v16 = vld [vmem:[#allocation3 + $0x68] sm:$0xf0] }
  0x14   :  { %165 = vmatpush.bf16.msra.mxu1 %v799_v4  ;;  %279 = vmatpush.bf16.msra.mxu2 %v693_v10  ;;  %v685_v17 = vor.u32 %v814_v13, %v684_v12  ;;  %v689_v18 = vor.u32 %v813_v15, %v686_v16  ;;  %v676_v19 = vld [vmem:[#allocation3 + $0x50] sm:$0xf]  ;;  %v812_v20 = vld [vmem:[#allocation3 + $0x54] sm:$0xf0]  ;;  %v811_v21 = vld [vmem:[#allocation3 + $0x54] sm:$0xf] }
  0x15   :  { %293 = vmatpush.bf16.msra.mxu3 %v697_v14  ;;  %v678_v22 = vld [vmem:[#allocation3 + $0x58] sm:$0xf0]  ;;  %v677_v23 = vor.u32 %v812_v20, %v676_v19  ;;  %v668_v25 = vld [vmem:[#allocation3 + $0x40] sm:$0xf]  ;;  %v810_v26 = vld [vmem:[#allocation3 + $0x44] sm:$0xf0] }
  0x16   :  { %v681_v24 = vor.u32 %v811_v21, %v678_v22  ;;  %v809_v27 = vld [vmem:[#allocation3 + $0x44] sm:$0xf]  ;;  %v670_v28 = vld [vmem:[#allocation3 + $0x48] sm:$0xf0]  ;;  %v669_v29 = vor.u32 %v810_v26, %v668_v25  ;;  %v850_v32 = vld [vmem:[%s1087_s2] ss:$0 sm:$0xff] }
  0x17   :  { %v673_v30 = vor.u32 %v809_v27, %v670_v28  ;;  %v660_v39 = vld [vmem:[#allocation3 + $0x30] sm:$0xf]  ;;  %v808_v40 = vld [vmem:[#allocation3 + $0x34] sm:$0xf0]  ;;  %v807_v41 = vld [vmem:[#allocation3 + $0x34] sm:$0xf] }
  0x18   :  { %166 = vmatpush.bf16.msra.mxu1 %v798_v5  ;;  %280 = vmatpush.bf16.msra.mxu2 %v685_v17  ;;  %v661_v42 = vor.u32 %v808_v40, %v660_v39  ;;  %v662_v43 = vld [vmem:[#allocation3 + $0x38] sm:$0xf0]  ;;  %v652_v45 = vld [vmem:[#allocation3 + $0x20] sm:$0xf]  ;;  %v806_v46 = vld [vmem:[#allocation3 + $0x24] sm:$0xf0] }
  0x19   :  { %294 = vmatpush.bf16.msra.mxu3 %v689_v18  ;;  %v665_v44 = vor.u32 %v807_v41, %v662_v43  ;;  %v805_v47 = vld [vmem:[#allocation3 + $0x24] sm:$0xf]  ;;  %v653_v48 = vor.u32 %v806_v46, %v652_v45  ;;  %v654_v49 = vld [vmem:[#allocation3 + $0x28] sm:$0xf0]  ;;  %v644_v51 = vld [vmem:[#allocation3 + $0x10] sm:$0xf] }
  0x1a   :  { %v657_v50 = vor.u32 %v805_v47, %v654_v49  ;;  %v804_v52 = vld [vmem:[#allocation3 + $0x14] sm:$0xf0]  ;;  %v803_v53 = vld [vmem:[#allocation3 + $0x14] sm:$0xf]  ;;  %v646_v55 = vld [vmem:[#allocation3 + $0x18] sm:$0xf0] }
  0x1b   :  { %v645_v54 = vor.u32 %v804_v52, %v644_v51  ;;  %v649_v56 = vor.u32 %v803_v53, %v646_v55  ;;  %v636_v57 = vld [vmem:[#allocation3] sm:$0xf]  ;;  %v802_v58 = vld [vmem:[#allocation3 + $0x4] sm:$0xf0]  ;;  %v801_v59 = vld [vmem:[#allocation3 + $0x4] sm:$0xf] }
  0x1c   :  { %167 = vmatpush.bf16.msra.mxu1 %v797_v6  ;;  %281 = vmatpush.bf16.msra.mxu2 %v677_v23  ;;  %v637_v60 = vor.u32 %v802_v58, %v636_v57  ;;  %v638_v61 = vld [vmem:[#allocation3 + $0x8] sm:$0xf0]  ;;  %v824_v63 = vld [vmem:[#allocation6 + $0x38] sm:$0xff]  ;;  %v823_v1 = vld [vmem:[#allocation6 + $0x30] sm:$0xff]  ;;  %s595_s14 = sshll.u32 %s939_s3, 4  ;;  %s596_s14 = int_to_ptr.vmem [resolvable:$true] %s595_s14 }
  0x1d   :  { %295 = vmatpush.bf16.msra.mxu3 %v681_v24  ;;  %v641_v62 = vor.u32 %v801_v59, %v638_v61  ;;  %v832_v0 = vld [vmem:[#allocation6 + $0x78] sm:$0xff]  ;;  %445 = vmatpush.bf16.msrb.mxu0 %v824_v63  ;;  %v831_v2 = vld [vmem:[#allocation6 + $0x70] sm:$0xff]  ;;  %v822_v3 = vld [vmem:[#allocation6 + $0x28] sm:$0xff]  ;;  %v938_v61 = vmov 0  }
  0x1e   :  { %v830_v4 = vld [vmem:[#allocation6 + $0x68] sm:$0xff]  ;;  %v821_v5 = vld [vmem:[#allocation6 + $0x20] sm:$0xff]  ;;  %v851_v8 = vld [vmem:[%s1089_s4] ss:$0 sm:$0xff]  ;;  %849 = vset.pattern.permute.xlu0 %v938_v61 }
  0x1f   :  { %v829_v6 = vld [vmem:[#allocation6 + $0x60] sm:$0xff]  ;;  %v820_v15 = vld [vmem:[#allocation6 + $0x18] sm:$0xff]  ;;  %v819_v17 = vld [vmem:[#allocation6 + $0x10] sm:$0xff] }
  0x20   :  { %282 = vmatpush.bf16.msra.mxu2 %v669_v29  ;;  %459 = vmatpush.bf16.msrb.mxu1 %v832_v0  ;;  %v828_v16 = vld [vmem:[#allocation6 + $0x58] sm:$0xff]  ;;  %v827_v18 = vld [vmem:[#allocation6 + $0x50] sm:$0xff]  ;;  %v818_v19 = vld [vmem:[#allocation6 + $0x8] sm:$0xff] }
  0x21   :  { %296 = vmatpush.bf16.msra.mxu3 %v673_v30  ;;  %446 = vmatpush.bf16.msrb.mxu0 %v823_v1  ;;  %v826_v20 = vld [vmem:[#allocation6 + $0x48] sm:$0xff]  ;;  %v817_v21 = vld [vmem:[#allocation6] sm:$0xff]  ;;  %v840_v23 = vld [vmem:[%s1094_s9 + $0x38] sm:$0xff] }
  0x22   :  { %v825_v22 = vld [vmem:[#allocation6 + $0x40] sm:$0xff]  ;;  %v839_v24 = vld [vmem:[%s1094_s9 + $0x30] sm:$0xff]  ;;  %v853_v63 = vld [vmem:[%s1095_s10] ss:$0 sm:$0xff] }
  0x23   :  { %v838_v25 = vld [vmem:[%s1094_s9 + $0x28] sm:$0xff]  ;;  %v837_v26 = vld [vmem:[%s1094_s9 + $0x20] sm:$0xff]  ;;  %v835_v45 = vld [vmem:[%s1094_s9 + $0x10] sm:$0xff] }
  0x24   :  { %283 = vmatpush.bf16.msra.mxu2 %v661_v42  ;;  %460 = vmatpush.bf16.msrb.mxu1 %v831_v2  ;;  %v193_v27 = vld [vmem:[%s1091_s6] sm:$0x3]  ;;  %v834_v46 = vld [vmem:[%s1094_s9 + $0x8] sm:$0xff] }
  0x25   :  { %297 = vmatpush.bf16.msra.mxu3 %v665_v44  ;;  %447 = vmatpush.bf16.msrb.mxu0 %v822_v3  ;;  %v195_v30 = vperm.slane %v193_v27, 0  ;;  %v836_v44 = vld [vmem:[%s1094_s9 + $0x18] sm:$0xff]  ;;  %v833_v47 = vld [vmem:[%s1094_s9] sm:$0xff] }
  0x28   :  { %284 = vmatpush.bf16.msra.mxu2 %v653_v48  ;;  %461 = vmatpush.bf16.msrb.mxu1 %v830_v4 }
  0x29   :  { %298 = vmatpush.bf16.msra.mxu3 %v657_v50  ;;  %448 = vmatpush.bf16.msrb.mxu0 %v821_v5  ;;  %v852_v50 = vld [vmem:[%s1093_s8] ss:$0 sm:$0xff] }
  0x2c   :  { %285 = vmatpush.bf16.msra.mxu2 %v645_v54  ;;  %462 = vmatpush.bf16.msrb.mxu1 %v829_v6 }
  0x2d   :  { %299 = vmatpush.bf16.msra.mxu3 %v649_v56  ;;  %449 = vmatpush.bf16.msrb.mxu0 %v820_v15 }
  0x30   :  { %286 = vmatpush.bf16.msra.mxu2 %v637_v60  ;;  %463 = vmatpush.bf16.msrb.mxu1 %v828_v16  ;;  %v562_v60 = vld [vmem:[#allocation2] sm:$0x1] }
  0x31   :  { %300 = vmatpush.bf16.msra.mxu3 %v641_v62  ;;  %450 = vmatpush.bf16.msrb.mxu0 %v819_v17 }
  0x32   :  { %565 = vperm.xlu0 %849, %v562_v60  }
  0x34   :  { %464 = vmatpush.bf16.msrb.mxu1 %v827_v18  ;;  %544 = vmatpush.bf16.msrb.mxu2 %v840_v23 }
  0x35   :  { %451 = vmatpush.bf16.msrb.mxu0 %v818_v19 }
  0x38   :  { %465 = vmatpush.bf16.msrb.mxu1 %v826_v20  ;;  %545 = vmatpush.bf16.msrb.mxu2 %v839_v24 }
  0x39   :  { %452 = vmatpush.bf16.msrb.mxu0 %v817_v21 }
  0x3c   :  { %466 = vmatpush.bf16.msrb.mxu1 %v825_v22  ;;  %546 = vmatpush.bf16.msrb.mxu2 %v838_v25 }
  0x40   :  { %547 = vmatpush.bf16.msrb.mxu2 %v837_v26 }
  0x44   :  { %548 = vmatpush.bf16.msrb.mxu2 %v836_v44 }
  0x48   :  { %549 = vmatpush.bf16.msrb.mxu2 %v835_v45 }
  0x4c   :  { %550 = vmatpush.bf16.msrb.mxu2 %v834_v46 }
  0x50   :  { %551 = vmatpush.bf16.msrb.mxu2 %v833_v47 }
  0x90   :  { %v112_v31 = vpop.f32.mrf.mxu0 }
  0x91   :  { %v113_v33 = vadd.f32 %v850_v32, %v112_v31  ;;  %v196_v31 = vperm.slane %v193_v27, 1 }
  0x93   :  { %v117_v36 = vmax.f32 %v113_v33, 0.0 }
  0x98   :  { %v114_v34 = vpop.f32.mrf.mxu0 }
  0x99   :  { %v115_v35 = vadd.f32 %v850_v32, %v114_v34 }
  0x9b   :  { %v118_v37 = vmax.f32 %v115_v35, 0.0 }
  0x9d   :  { %v119_v38 = vpack.c.bf16 %v118_v37, %v117_v36 }
  0x9f   :  { %633 = vmatmul.msk.bf16.vlgmr.msra.gmra.mxu1 %vm156_vm1, %v119_v38 }
 0x11c   :  { %v169_v7 = vpop.f32.mrf.mxu1 }
 0x11d   :  { %v170_v9 = vadd.f32 %v851_v8, %v169_v7  ;;  %v561_v7 = vld [vmem:[%s1096_s11] sm:$0x1] }
 0x11f   :  { %v174_v12 = vmax.f32 %v170_v9, 0.0 }
 0x124   :  { %v171_v10 = vpop.f32.mrf.mxu1 }
 0x125   :  { %v172_v11 = vadd.f32 %v851_v8, %v171_v10  ;;  %v566_v8 = vpop.permute.xlu0 %565 }
 0x126   :  { %v568_v9 = vperm.slane %v566_v8, 0 }
 0x127   :  { %v175_v13 = vmax.f32 %v172_v11, 0.0 }
 0x129   :  { %v176_v14 = vpack.c.bf16 %v175_v13, %v174_v12 }
 0x12b   :  { %287 = vmatmul.bf16.vlgmr.msra.gmra.mxu2 %v176_v14  ;;  %301 = vmatmul.bf16.vlgmr.msra.gmra.mxu3 %v176_v14 }
 0x1ae   :  { %v288_v28 = vpop.f32.mrf.mxu2  ;;  %v302_v29 = vpop.f32.mrf.mxu3 }
 0x1af   :  { %v289_v32 = vadd.f32 %v288_v28, %v195_v30  ;;  %v303_v33 = vadd.f32 %v302_v29, %v196_v31 }
 0x1b1   :  { %v307_v38 = vmax.f32 %v289_v32, 0.0  ;;  %v308_v39 = vmax.f32 %v303_v33, 0.0 }
 0x1b6   :  { %v290_v34 = vpop.f32.mrf.mxu2  ;;  %v304_v35 = vpop.f32.mrf.mxu3 }
 0x1b7   :  { %v291_v36 = vadd.f32 %v290_v34, %v195_v30  ;;  %v305_v37 = vadd.f32 %v304_v35, %v196_v31 }
 0x1b9   :  { %v309_v40 = vmax.f32 %v291_v36, 0.0  ;;  %v310_v41 = vmax.f32 %v305_v37, 0.0 }
 0x1bb   :  { %v311_v42 = vpack.c.bf16 %v309_v40, %v307_v38  ;;  %v312_v43 = vpack.c.bf16 %v310_v41, %v308_v39 }
 0x1bd   :  { %453 = vmatmul.bf16.vlgmr.msrb.gmra.mxu0 %v311_v42  ;;  %467 = vmatmul.bf16.vlgmr.msrb.gmra.mxu1 %v312_v43 }
 0x23a   :  { %v454_v48 = vpop.f32.mrf.mxu0  ;;  %v468_v49 = vpop.f32.mrf.mxu1 }
 0x23b   :  { %v455_v51 = vadd.f32 %v852_v50, %v454_v48 }
 0x23d   :  { %v469_v53 = vadd.f32 %v468_v49, %v455_v51 }
 0x23f   :  { %v473_v57 = vmax.f32 %v469_v53, 0.0 }
 0x242   :  { %v456_v52 = vpop.f32.mrf.mxu0  ;;  %v470_v55 = vpop.f32.mrf.mxu1 }
 0x243   :  { %v457_v54 = vadd.f32 %v852_v50, %v456_v52 }
 0x245   :  { %v471_v56 = vadd.f32 %v470_v55, %v457_v54 }
 0x247   :  { %v474_v58 = vmax.f32 %v471_v56, 0.0 }
 0x249   :  { %v475_v59 = vpack.c.bf16 %v474_v58, %v473_v57 }
 0x24b   :  { %552 = vmatmul.bf16.vlgmr.msrb.gmra.mxu2 %v475_v59 }
 0x2ce   :  { %v553_v62 = vpop.f32.mrf.mxu2 }
 0x2cf   :  { %v554_v0 = vadd.f32 %v853_v63, %v553_v62 }
 0x2d1   :  { %v558_v3 = vmax.f32 %v554_v0, 0.0 }
 0x2d6   :  { %v555_v1 = vpop.f32.mrf.mxu2 }
 0x2d7   :  { %v556_v2 = vadd.f32 %v853_v63, %v555_v1 }
 0x2d9   :  { %v559_v4 = vmax.f32 %v556_v2, 0.0 }
 0x2db   :  { %v560_v5 = vpack.c.bf16 %v559_v4, %v558_v3 }
 0x2dd   :  { %v573_v6 = vsel %vm156_vm1, %v560_v5, 0 }
 0x2de   :  { %582 = vmatpush.bf16.xpose.msrb.mxu3 %v573_v6 }
 0x2e5   :  { %794 = vmatmul.msk.bf16.vlgmr.msrb.gmra.mxu3 %vm156_vm1, %v561_v7 }
 0x368   :  { %v584_v10 = vpop.f32.mrf.mxu3 }
 0x369   :  { %v585_v11 = vadd.f32 %v584_v10, %v568_v9 }
 0x36b   :  { %589 = vst.msk [vmem:[#allocation8] sm:$0x1] %vm588_vm2, %v585_v11 }
 0x36c   :  { %600 = dma.vmem_to_hbm [thread:$0]  %s596_s14, 16, %s598_s15, [#allocation5]  }
 0x370   :  { %v586_v12 = vpop.f32.mrf.mxu3 }
 0x371   :  { %930 = dma.done.wait [#allocation5], 16  }
 0x372   :  { %931 = vsyncadd [#allocation5], 4294967280 }
 0x373   :  { %605 = vsyncpa [#allocation4], 1 }
 0x374   :  { %606 = vsyncpa [#allocation7], 1 }
 0x375   :  { %607 = vsyncpa [#allocation5], 1 }

</bundles_post_ra>
